<compile_context>
chip_gen: v5e
topology: v5e:2x2
jax: 0.10.0
libtpu: 0.0.40
codegen_flags: <defaults>
</compile_context>

<pallas_src>
import jax
import jax.numpy as jnp
from jax.experimental import pallas as pl
from jax.experimental.pallas import tpu as pltpu
import numpy as np


def fusion_kernel(w_ref, x_ref, o_ref):
    # w_ref: (2, LF) f32  — precomputed softmax weights, expanded to lanes
    # x_ref: (2, TB, LF)  — TB batch rows of the (B, L*F) view, both locations
    # o_ref: (TB, LF)
    w0 = w_ref[0:1, :]                                   # (1, LF) sublane-bcast
    w1 = w_ref[1:2, :]                                   # (1, LF)
    fused = w0 * x_ref[0, :, :] + w1 * x_ref[1, :, :]    # 2 mul + 1 add / elem
    o_ref[...] = fused.astype(o_ref.dtype)


def _vmem_limit_bytes():
    """Per-generation scoped-VMEM limit: 3/4 of physical, capped at 96 MiB.
    Fallback (48 MiB) is safe on v5e/v6e (128 MiB) and v7x (64 MiB per TC)."""
    try:
        cap = int(pltpu.get_tpu_info().vmem_capacity_bytes)
    except Exception:
        cap = 64 << 20
    return min((cap * 3) // 4, 96 << 20)


def _choose_row_tile(B, lanes, itemsize, budget_bytes, min_steps=2):
    """Row tile TB for the (2, TB, lanes) x slab.

    - TB is a multiple of the sublane packing factor (8 f32 / 16 bf16 / 32 i8)
      unless the whole batch is smaller than that, in which case TB = B
      (block dim == array dim is always legal).
    - The grid uses cdiv(B, TB): the last block may be partial (masked store).
    - TB is capped so the grid has >= min_steps steps (v7x megacore sharding)
      and so the slab stays within budget_bytes.
    """
    sub = max(8, (8 * 4) // itemsize)          # sublane packing multiple
    if B <= sub:
        return B                               # single small block, full extent
    max_rows = max(sub, (budget_bytes // (2 * lanes * itemsize)) // sub * sub)
    per_step = pl.cdiv(B, min_steps)           # rows/step to get >= min_steps
    per_step = max(sub, (per_step // sub) * sub)
    return min(max_rows, per_step)


def each_location_feature_fusion(x, w, *, force_pallas=False):
    """x: (2, B, Len, F) ; w: (2, Len) -> (B, Len, F)."""
    two, B, L, F = x.shape
    assert two == 2 and w.shape == (2, L)
    LF = L * F
    itemsize = jnp.dtype(x.dtype).itemsize

    # Batch-independent softmax over the two "locations", hoisted out of the
    # kernel.  Lane index l*F + f of the (B, L*F) view carries sm[:, l].
    sm = jax.nn.softmax(w.astype(jnp.float32), axis=0)          # (2, L)

    # Tiny problems or lane-unfriendly LF: plain XLA FMA beats kernel launch
    # overhead / masked partial stores.
    x_bytes = x.size * itemsize
    if not force_pallas and (x_bytes < (1 << 20) or LF % 128 != 0):
        return jnp.sum(sm[:, None, :, None] * x, axis=0).astype(x.dtype)

    w_lanes = jnp.repeat(sm, F, axis=1)                          # (2, L*F) f32
    x2 = x.reshape(2, B, LF)                                     # lane-dense

    vmem_limit = _vmem_limit_bytes()
    # Total footprint ~ 2*x_slab (dbl-buffered) + 2*out_slab = 3*x_slab, so a
    # quarter-of-limit slab budget leaves ~25% headroom for weights/scratch.
    x_budget = vmem_limit // 4
    TB = _choose_row_tile(B, LF, itemsize, x_budget)
    grid = (pl.cdiv(B, TB),)

    cost = pl.CostEstimate(
        flops=3 * B * LF,
        transcendentals=0,
        bytes_accessed=3 * B * LF * itemsize + 2 * LF * 4,
    )

    out2 = pl.pallas_call(
        fusion_kernel,
        out_shape=jax.ShapeDtypeStruct((B, LF), x.dtype),
        grid_spec=pltpu.PrefetchScalarGridSpec(
            num_scalar_prefetch=0,
            grid=grid,
            in_specs=[
                pl.BlockSpec((2, LF), lambda i: (0, 0)),           # weights
                pl.BlockSpec((2, TB, LF), lambda i: (0, i, 0)),    # x row tile
            ],
            out_specs=pl.BlockSpec((TB, LF), lambda i: (i, 0)),
        ),
        compiler_params=pltpu.CompilerParams(
            dimension_semantics=("parallel",),
            vmem_limit_bytes=vmem_limit,
        ),
        cost_estimate=cost,
    )(w_lanes, x2)
    return out2.reshape(B, L, F)


def make_params(loc_weight, length):
    # Mirrors nn.Parameter(torch.from_numpy(np.array([LocWeight, 1.0]))
    #                      .unsqueeze(1).repeat(1, Len).float())
    base = np.array([loc_weight, 1.0], dtype=np.float64)[:, None]     # (2, 1)
    w = np.repeat(base, length, axis=1).astype(np.float32)            # (2, Len)
    return jnp.asarray(w)


if __name__ == "__main__":
    NumOfFeature = 32
    Len = 8
    LocWeight = 0.3

    w = make_params(LocWeight, Len)                                   # (2, Len)
    sm = jax.nn.softmax(w, axis=0)                                    # (2, Len)

    key = jax.random.PRNGKey(0)

    # B=4: single full-extent block.  B=13: two blocks with a partial tail
    # (exercises cdiv grid + masked last store).  force_pallas=True so the
    # Pallas kernel itself runs even at these tiny test shapes.
    for B in (4, 13):
        key, kx = jax.random.split(key)
        x = jax.random.normal(kx, (2, B, Len, NumOfFeature), dtype=jnp.float32)

        out = each_location_feature_fusion(x, w, force_pallas=True)
        out = jax.block_until_ready(out)

        ref = jnp.sum(sm[:, None, :, None] * x, axis=0)               # (B, L, F)
        assert out.shape == (B, Len, NumOfFeature)
        np.testing.assert_allclose(np.asarray(out), np.asarray(ref),
                                   rtol=1e-6, atol=1e-6)

        # Also check the small-problem XLA bypass path used in production.
        out_bypass = jax.block_until_ready(each_location_feature_fusion(x, w))
        np.testing.assert_allclose(np.asarray(out_bypass), np.asarray(ref),
                                   rtol=1e-6, atol=1e-6)

    print("KERNEL_OK")
</pallas_src>

<mosaic_0001>
module attributes {stable_mosaic.version = 11 : i64} {
  func.func @fusion_kernel(%arg0: i32, %arg1: memref<2x256xf32, #tpu.memory_space<vmem>>, %arg2: memref<2x4x256xf32, #tpu.memory_space<vmem>>, %arg3: memref<4x256xf32, #tpu.memory_space<vmem>>) attributes {dimension_semantics = [#tpu.dimension_semantics<parallel>], iteration_bounds = array<i64: 1>, scalar_prefetch = 0 : i64, scratch_operands = 0 : i64, tpu.core_type = #tpu.core_type<tc>, window_params = [{pipeline_mode = #tpu.pipeline_mode<synchronous>, transform_indices = @transform_0, window_bounds = array<i64: 2, 256>}, {transform_indices = @transform_1, window_bounds = array<i64: 2, 4, 256>}, {transform_indices = @transform_2, window_bounds = array<i64: 4, 256>}]} {
    %c0 = arith.constant 0 : index
    %c0_0 = arith.constant 0 : index
    %0 = vector.load %arg1[%c0, %c0_0] : memref<2x256xf32, #tpu.memory_space<vmem>>, vector<1x256xf32>
    %c1 = arith.constant 1 : index
    %c0_1 = arith.constant 0 : index
    %1 = vector.load %arg1[%c1, %c0_1] : memref<2x256xf32, #tpu.memory_space<vmem>>, vector<1x256xf32>
    %c0_2 = arith.constant 0 : index
    %c0_3 = arith.constant 0 : index
    %c0_4 = arith.constant 0 : index
    %2 = vector.load %arg2[%c0_2, %c0_3, %c0_4] : memref<2x4x256xf32, #tpu.memory_space<vmem>>, vector<1x4x256xf32>
    %3 = vector.shape_cast %2 : vector<1x4x256xf32> to vector<4x256xf32>
    %4 = vector.broadcast %0 : vector<1x256xf32> to vector<4x256xf32>
    %5 = arith.mulf %4, %3 : vector<4x256xf32>
    %c1_5 = arith.constant 1 : index
    %c0_6 = arith.constant 0 : index
    %c0_7 = arith.constant 0 : index
    %6 = vector.load %arg2[%c1_5, %c0_6, %c0_7] : memref<2x4x256xf32, #tpu.memory_space<vmem>>, vector<1x4x256xf32>
    %7 = vector.shape_cast %6 : vector<1x4x256xf32> to vector<4x256xf32>
    %8 = vector.broadcast %1 : vector<1x256xf32> to vector<4x256xf32>
    %9 = arith.mulf %8, %7 : vector<4x256xf32>
    %10 = arith.addf %5, %9 : vector<4x256xf32>
    %c0_8 = arith.constant 0 : index
    %c0_9 = arith.constant 0 : index
    %11 = vector.load %arg3[%c0_8, %c0_9] : memref<4x256xf32, #tpu.memory_space<vmem>>, vector<4x256xf32>
    tpu.vector_store %arg3[%c0_8, %c0_9], %10 {strides = array<i32>} : memref<4x256xf32, #tpu.memory_space<vmem>>, vector<4x256xf32>,
    return
  }
  func.func @transform_0(%arg0: i32) -> (i32, i32) {
    %c0_i32 = arith.constant 0 : i32
    %c0_i32_0 = arith.constant 0 : i32
    %c0_i32_1 = arith.constant 0 : i32
    return %c0_i32, %c0_i32_0 : i32, i32
  }
  func.func @transform_1(%arg0: i32) -> (i32, i32, i32) {
    %c0_i32 = arith.constant 0 : i32
    %c0_i32_0 = arith.constant 0 : i32
    %c0_i32_1 = arith.constant 0 : i32
    return %c0_i32, %arg0, %c0_i32_0 : i32, i32, i32
  }
  func.func @transform_2(%arg0: i32) -> (i32, i32) {
    %c0_i32 = arith.constant 0 : i32
    %c0_i32_0 = arith.constant 0 : i32
    return %arg0, %c0_i32 : i32, i32
  }
}

</mosaic_0001>

<bundles_post_ra>
// kernel: tpu_custom_call.1
= control target key start
LH: loop header
LB: loop body
LE: loop exit
PB: predicated region body
PF: predicated region fallthrough
CT: control target
= control target key end

     0   :  { %7 = vsyncpa [#allocation3], 0  ;;  %s213_s0 = inlined_call_operand.hbm [shape: f32[2,256], index: 0, kind: input, shape index: {}]   ;;  %s214_s1 = inlined_call_operand.hbm [shape: f32[2,4,256], index: 1, kind: input, shape index: {}]   ;;  %s215_s2 = inlined_call_operand.hbm [shape: f32[4,256], index: 2, kind: output, shape index: {}]  }
   0x1   :  { %8 = vsyncpa [#allocation6], 0 }
   0x2   :  { %9 = vsyncpa [#allocation4], 0  ;;  %s15_s11 = sshll.u32 %s213_s0, 4  ;;  %s184_s12 = smov [#allocation2]   ;;  %s16_s11 = int_to_ptr.hbm [resolvable:$true] %s15_s11 }
   0x3   :  { %s17_s13 = sshll.u32 %s184_s12, 4  ;;  %s25_s16 = sshll.u32 %s214_s1, 4  ;;  %s18_s13 = int_to_ptr.vmem [resolvable:$true] %s17_s13  ;;  %s26_s16 = int_to_ptr.hbm [resolvable:$true] %s25_s16 }
   0x4   :  { %20 = dma.hbm_to_vmem [thread:$0]  %s16_s11, 64, %s18_s13, [#allocation3]  }
   0x5   :  { %s185_s17 = smov [#allocation5]   ;;  %s186_s19 = smov 128  }
   0x6   :  { %s27_s18 = sshll.u32 %s185_s17, 4  ;;  %s187_s20 = smov 8   ;;  %s28_s18 = int_to_ptr.vmem [resolvable:$true] %s27_s18 }
   0x7   :  { %33 = dma.hbm_to_vmem [thread:$0]  %s26_s16, 256, %s28_s18, [#allocation6], %s186_s19, %s186_s19, %s187_s20  }
   0x8   :  { %178 = dma.done.wait [#allocation3], 64  }
   0x9   :  { %179 = vsyncadd [#allocation3], 4294967232 }
   0xa   :  { %180 = dma.done.wait [#allocation6], 256  }
   0xb   :  { %181 = vsyncadd [#allocation6], 4294967040  ;;  %v45_v0 = vld [vmem:[#allocation5] sm:$0xff]  ;;  %v60_v1 = vld [vmem:[#allocation5 + $0x8] sm:$0xff]  ;;  %s188_s0 = smov [#allocation7]   ;;  %s90_s23 = sshll.u32 %s215_s2, 4  ;;  %s91_s23 = int_to_ptr.hbm [resolvable:$true] %s90_s23 }
   0xc   :  { %52 = vst [vmem:[#allocation1] ss:$2 sm:$0xff] %v45_v0  ;;  %v42_v4 = vld [vmem:[#allocation2] ss:$2 sm:$0x3]  ;;  %s88_s1 = sshll.u32 %s188_s0, 4  ;;  %s89_s1 = int_to_ptr.vmem [resolvable:$true] %s88_s1 }
   0xd   :  { %v44_v5 = vld [vmem:[#allocation2 + $0x1] ss:$2 sm:$0x3]  ;;  %v48_v6 = vperm.slane %v42_v4, 1  ;;  %v47_v9 = vperm.slane %v42_v4, 0  ;;  %vm79_vm0 = vcmask 1043456  }
   0xe   :  { %v62_v7 = vperm.slane %v44_v5, 0  ;;  %v63_v8 = vperm.slane %v44_v5, 1 }
  0x13   :  { %v53_v2 = vld.sshfl [vmem:[#allocation1] sm:$0xff pattern:$0x75316420]  ;;  %v54_v3 = vld.sshfl [vmem:[#allocation1 + $0x8] sm:$0xff pattern:$0x75316420] }
  0x14   :  { %67 = vst [vmem:[#allocation1] ss:$2 sm:$0xff] %v60_v1  ;;  %v58_v12 = vmul.f32 %v54_v3, %v48_v6  ;;  %v57_v15 = vmul.f32 %v53_v2, %v47_v9 }
  0x1b   :  { %v68_v10 = vld.sshfl [vmem:[#allocation1] sm:$0xff pattern:$0x75316420]  ;;  %v69_v11 = vld.sshfl [vmem:[#allocation1 + $0x8] sm:$0xff pattern:$0x75316420] }
  0x1c   :  { %v72_v13 = vmul.f32 %v68_v10, %v62_v7  ;;  %v73_v14 = vmul.f32 %v69_v11, %v63_v8 }
  0x1e   :  { %v75_v16 = vadd.f32 %v73_v14, %v58_v12  ;;  %v74_v17 = vadd.f32 %v72_v13, %v57_v15 }
  0x20   :  { %v78_v18 = vrot.slane %v75_v16, 4 }
  0x22   :  { %v80_v19 = vsel %vm79_vm0, %v74_v17, %v78_v18 }
  0x23   :  { %82 = vst [vmem:[#allocation7] sm:$0xff] %v80_v19 }
  0x24   :  { %93 = dma.vmem_to_hbm [thread:$0]  %s89_s1, 128, %s91_s23, [#allocation4]  }
  0x25   :  { %182 = dma.done.wait [#allocation4], 128  }
  0x26   :  { %183 = vsyncadd [#allocation4], 4294967168 }
  0x27   :  { %98 = vsyncpa [#allocation3], 1 }
  0x28   :  { %99 = vsyncpa [#allocation6], 1 }
  0x29   :  { %100 = vsyncpa [#allocation4], 1 }

</bundles_post_ra>
